<compile_context>
chip_gen: v5e
topology: v5e:2x2
jax: 0.10.0
libtpu: 0.0.40
codegen_flags: <defaults>
</compile_context>

<pallas_src>
import jax
import jax.numpy as jnp
from jax import lax
from jax.experimental import pallas as pl
from jax.experimental.pallas import tpu as pltpu


# ----------------------------- model dimensions ------------------------------
B      = 2    # batch
T_ENC  = 8    # encoder (video/audio) time steps
T_DEC  = 8    # decoder (target) time steps
D_V    = 16   # video feature dim
D_A    = 16   # audio feature dim
D_VA   = D_V + D_A   # fused video+audio feature dim
H      = 32   # hidden dim
VOCAB  = 32   # vocab size
PAD_ID = 0

BT_ENC = B * T_ENC   # flattened encoder rows
BT_DEC = B * T_DEC   # flattened decoder rows

assert H == VOCAB, "param-slab packing assumes H == VOCAB (single lane width)"
assert T_DEC & (T_DEC - 1) == 0 and T_ENC & (T_ENC - 1) == 0, "block mask uses shifts"
_Q_SHIFT = T_DEC.bit_length() - 1
_K_SHIFT = T_ENC.bit_length() - 1

# parameter-slab row offsets (all params packed into one (N_SLAB_ROWS, H) f32 array)
ROW_W_ENC = 0
ROW_WM    = ROW_W_ENC + D_VA       # 32
ROW_WE    = ROW_WM + H             # 64
ROW_WQ    = ROW_WE + VOCAB         # 96
ROW_WK    = ROW_WQ + H             # 128
ROW_WV    = ROW_WK + H             # 160
ROW_WO    = ROW_WV + H             # 192
ROW_B     = ROW_WO + H             # 224  (biases, padded to an 8-row aligned block)
N_SLAB_ROWS = ROW_B + 8            # 232


# --------------------------------- kernel ------------------------------------
def attention_model_kernel(
    va_ref,    # (BT_ENC, D_VA)      f32  concat(video, audio) rows, batch-flattened
    tgt_ref,   # (BT_DEC, 1)         i32  target token ids, batch-flattened
    p_ref,     # (N_SLAB_ROWS, H)    f32  packed parameter slab
    out_ref,   # (BT_DEC, VOCAB)     f32  log-probabilities
):
    f32 = jnp.float32

    # ---- parameters: static row slices of the single VMEM-resident slab ----
    w_enc = p_ref[ROW_W_ENC:ROW_W_ENC + D_VA, :]
    wm    = p_ref[ROW_WM:ROW_WM + H, :]
    we    = p_ref[ROW_WE:ROW_WE + VOCAB, :]
    wq    = p_ref[ROW_WQ:ROW_WQ + H, :]
    wk    = p_ref[ROW_WK:ROW_WK + H, :]
    wvv   = p_ref[ROW_WV:ROW_WV + H, :]
    wo    = p_ref[ROW_WO:ROW_WO + H, :]
    b_all = p_ref[ROW_B:ROW_B + 8, :]          # (8, H) aligned bias block
    b_enc = b_all[0:1, :]
    b_m   = b_all[1:2, :]
    b_e   = b_all[2:3, :]
    b_o   = b_all[3:4, :]

    # ---- encoder: fused (video|audio) linear + relu, then "medium" linear + tanh ----
    feat = jnp.dot(va_ref[...], w_enc, preferred_element_type=f32) + b_enc
    feat = jnp.maximum(feat, 0.0)
    feat = jnp.tanh(jnp.dot(feat, wm, preferred_element_type=f32) + b_m)   # (BT_ENC, H)

    # ---- embedder: F.one_hot(targets).float() @ We, one-hot built in-kernel ----
    tgt = tgt_ref[...]                                                     # (BT_DEC, 1) i32
    vocab_iota = lax.broadcasted_iota(jnp.int32, (BT_DEC, VOCAB), 1)
    onehot = (vocab_iota == tgt).astype(f32)                               # (BT_DEC, VOCAB)
    emb = jnp.dot(onehot, we, preferred_element_type=f32) + b_e            # (BT_DEC, H)
    emb = emb * (tgt != PAD_ID).astype(f32)                                # zero padded targets

    # ---- decoder: single-head cross attention, both batches in one 16x16 block ----
    q = jnp.dot(emb,  wq,  preferred_element_type=f32)                     # (BT_DEC, H)
    k = jnp.dot(feat, wk,  preferred_element_type=f32)                     # (BT_ENC, H)
    v = jnp.dot(feat, wvv, preferred_element_type=f32)                     # (BT_ENC, H)

    scale = H ** -0.5
    scores = lax.dot_general(q, k, (((1,), (1,)), ((), ())),
                             preferred_element_type=f32) * scale           # (BT_DEC, BT_ENC)

    # block-diagonal mask: each query row only attends to its own batch's encoder rows
    q_blk = lax.broadcasted_iota(jnp.int32, (BT_DEC, BT_ENC), 0) >> _Q_SHIFT
    k_blk = lax.broadcasted_iota(jnp.int32, (BT_DEC, BT_ENC), 1) >> _K_SHIFT
    scores = jnp.where(q_blk == k_blk, scores, f32(-1e30))

    # softmax over encoder positions (masked entries -> exp underflows to 0)
    s_max = scores.max(axis=-1, keepdims=True)
    p = jnp.exp(scores - s_max)
    p = p * pl.reciprocal(p.sum(axis=-1, keepdims=True), approx=True)
    ctx = jnp.dot(p, v, preferred_element_type=f32)                        # (BT_DEC, H)

    logits = jnp.dot(ctx, wo, preferred_element_type=f32) + b_o            # (BT_DEC, VOCAB)

    # ---- log_softmax over vocab, single full-block store ----
    l_max = logits.max(axis=-1, keepdims=True)
    shifted = logits - l_max
    lse = jnp.log(jnp.exp(shifted).sum(axis=-1, keepdims=True))
    out_ref[...] = shifted - lse


# --------------------------------- wrapper ------------------------------------
def pack_params(params):
    """Pack all weights & biases into one lane-aligned (N_SLAB_ROWS, H) slab -> one DMA."""
    w_enc = jnp.concatenate([params["wv"], params["wa"]], axis=0)          # (D_VA, H)
    biases = jnp.concatenate(
        [params["b_enc"], params["b_m"], params["b_e"], params["b_o"],
         jnp.zeros((4, H), jnp.float32)], axis=0)                          # (8, H)
    slab = jnp.concatenate(
        [w_enc, params["wm"], params["we"], params["wq"], params["wk"],
         params["wvv"], params["wo"], biases], axis=0)
    assert slab.shape == (N_SLAB_ROWS, H)
    return slab


@jax.jit
def attention_model_forward(video_inputs, video_input_lengths,
                            audio_inputs, audio_input_lengths,
                            targets, target_lengths, param_slab):
    # TODO(synk): length masking of encoder frames / targets is unspecified in the
    #             reference (submodules are None), so the lengths are unused here.
    del video_input_lengths, audio_input_lengths, target_lengths

    # glue (plain JAX): fuse the two encoder streams on lanes, flatten batch to rows
    va = jnp.concatenate([video_inputs, audio_inputs], axis=-1)            # (B, T_ENC, D_VA)
    va = va.reshape(BT_ENC, D_VA)
    tgt = targets.reshape(BT_DEC, 1).astype(jnp.int32)

    vmem = pltpu.MemorySpace.VMEM
    out = pl.pallas_call(
        attention_model_kernel,
        out_shape=jax.ShapeDtypeStruct((BT_DEC, VOCAB), jnp.float32),
        in_specs=[pl.BlockSpec(memory_space=vmem),   # va
                  pl.BlockSpec(memory_space=vmem),   # targets
                  pl.BlockSpec(memory_space=vmem)],  # packed params (invariant, no pipelining)
        out_specs=pl.BlockSpec(memory_space=vmem),
    )(va, tgt, param_slab)
    return out.reshape(B, T_DEC, VOCAB)


def init_params(key):
    ks = jax.random.split(key, 12)
    scale = 0.1
    return {
        "wv":    scale * jax.random.normal(ks[0],  (D_V, H),    jnp.float32),
        "wa":    scale * jax.random.normal(ks[1],  (D_A, H),    jnp.float32),
        "b_enc": scale * jax.random.normal(ks[2],  (1, H),      jnp.float32),
        "wm":    scale * jax.random.normal(ks[3],  (H, H),      jnp.float32),
        "b_m":   scale * jax.random.normal(ks[4],  (1, H),      jnp.float32),
        "we":    scale * jax.random.normal(ks[5],  (VOCAB, H),  jnp.float32),
        "b_e":   scale * jax.random.normal(ks[6],  (1, H),      jnp.float32),
        "wq":    scale * jax.random.normal(ks[7],  (H, H),      jnp.float32),
        "wk":    scale * jax.random.normal(ks[8],  (H, H),      jnp.float32),
        "wvv":   scale * jax.random.normal(ks[9],  (H, H),      jnp.float32),
        "wo":    scale * jax.random.normal(ks[10], (H, VOCAB),  jnp.float32),
        "b_o":   scale * jax.random.normal(ks[11], (1, VOCAB),  jnp.float32),
    }


# ------------------------- pure-JAX reference (checking) ----------------------
def reference_forward(video, audio, targets, params):
    feat = jax.nn.relu(video @ params["wv"] + audio @ params["wa"] + params["b_enc"])
    feat = jnp.tanh(feat @ params["wm"] + params["b_m"])
    onehot = jax.nn.one_hot(targets, VOCAB, dtype=jnp.float32)
    emb = onehot @ params["we"] + params["b_e"]
    emb = emb * (targets != PAD_ID).astype(jnp.float32)[..., None]
    q = emb @ params["wq"]
    k = feat @ params["wk"]
    v = feat @ params["wvv"]
    scores = jnp.einsum("btd,bsd->bts", q, k) / jnp.sqrt(jnp.float32(H))
    p = jax.nn.softmax(scores, axis=-1)
    ctx = jnp.einsum("bts,bsd->btd", p, v)
    logits = ctx @ params["wo"] + params["b_o"]
    return jax.nn.log_softmax(logits, axis=-1)


# ----------------------------------- main -------------------------------------
if __name__ == "__main__":
    key = jax.random.PRNGKey(0)
    k_v, k_a, k_t, k_p = jax.random.split(key, 4)

    video_inputs = jax.random.normal(k_v, (B, T_ENC, D_V), jnp.float32)
    audio_inputs = jax.random.normal(k_a, (B, T_ENC, D_A), jnp.float32)
    targets = jax.random.randint(k_t, (B, T_DEC), 0, VOCAB, dtype=jnp.int32)
    video_input_lengths = jnp.full((B,), T_ENC, jnp.int32)
    audio_input_lengths = jnp.full((B,), T_ENC, jnp.int32)
    target_lengths = jnp.full((B,), T_DEC, jnp.int32)

    params = init_params(k_p)
    param_slab = pack_params(params)   # packed once, reused across calls

    out = attention_model_forward(video_inputs, video_input_lengths,
                                  audio_inputs, audio_input_lengths,
                                  targets, target_lengths, param_slab)
    out = jax.block_until_ready(out)

    ref = reference_forward(video_inputs, audio_inputs, targets, params)
    assert out.shape == (B, T_DEC, VOCAB)
    # slightly looser than 1e-4 to cover the EUP approximate reciprocal in the softmax
    assert jnp.allclose(out, ref, atol=2e-3, rtol=2e-3), "mismatch vs pure-JAX reference"

    print("KERNEL_OK")
</pallas_src>

<mosaic_0001>
module attributes {stable_mosaic.version = 11 : i64} {
  func.func @attention_model_kernel(%arg0: memref<16x32xf32, #tpu.memory_space<vmem>>, %arg1: memref<16x1xi32, #tpu.memory_space<vmem>>, %arg2: memref<232x32xf32, #tpu.memory_space<vmem>>, %arg3: memref<16x32xf32, #tpu.memory_space<vmem>>) attributes {dimension_semantics = [], scalar_prefetch = 0 : i64, scratch_operands = 0 : i64, tpu.core_type = #tpu.core_type<tc>} {
    %c0 = arith.constant 0 : index
    %c0_0 = arith.constant 0 : index
    %0 = vector.load %arg2[%c0, %c0_0] : memref<232x32xf32, #tpu.memory_space<vmem>>, vector<32x32xf32>
    %c32 = arith.constant 32 : index
    %c0_1 = arith.constant 0 : index
    %1 = vector.load %arg2[%c32, %c0_1] : memref<232x32xf32, #tpu.memory_space<vmem>>, vector<32x32xf32>
    %c64 = arith.constant 64 : index
    %c0_2 = arith.constant 0 : index
    %2 = vector.load %arg2[%c64, %c0_2] : memref<232x32xf32, #tpu.memory_space<vmem>>, vector<32x32xf32>
    %c96 = arith.constant 96 : index
    %c0_3 = arith.constant 0 : index
    %3 = vector.load %arg2[%c96, %c0_3] : memref<232x32xf32, #tpu.memory_space<vmem>>, vector<32x32xf32>
    %c128 = arith.constant 128 : index
    %c0_4 = arith.constant 0 : index
    %4 = vector.load %arg2[%c128, %c0_4] : memref<232x32xf32, #tpu.memory_space<vmem>>, vector<32x32xf32>
    %c160 = arith.constant 160 : index
    %c0_5 = arith.constant 0 : index
    %5 = vector.load %arg2[%c160, %c0_5] : memref<232x32xf32, #tpu.memory_space<vmem>>, vector<32x32xf32>
    %c192 = arith.constant 192 : index
    %c0_6 = arith.constant 0 : index
    %6 = vector.load %arg2[%c192, %c0_6] : memref<232x32xf32, #tpu.memory_space<vmem>>, vector<32x32xf32>
    %c224 = arith.constant 224 : index
    %c0_7 = arith.constant 0 : index
    %7 = vector.load %arg2[%c224, %c0_7] : memref<232x32xf32, #tpu.memory_space<vmem>>, vector<8x32xf32>
    %8 = vector.extract_strided_slice %7 {offsets = [0, 0], sizes = [1, 32], strides = [1, 1]} : vector<8x32xf32> to vector<1x32xf32>
    %9 = vector.extract_strided_slice %7 {offsets = [1, 0], sizes = [1, 32], strides = [1, 1]} : vector<8x32xf32> to vector<1x32xf32>
    %10 = vector.extract_strided_slice %7 {offsets = [2, 0], sizes = [1, 32], strides = [1, 1]} : vector<8x32xf32> to vector<1x32xf32>
    %11 = vector.extract_strided_slice %7 {offsets = [3, 0], sizes = [1, 32], strides = [1, 1]} : vector<8x32xf32> to vector<1x32xf32>
    %c0_8 = arith.constant 0 : index
    %c0_9 = arith.constant 0 : index
    %12 = vector.load %arg0[%c0_8, %c0_9] : memref<16x32xf32, #tpu.memory_space<vmem>>, vector<16x32xf32>
    %cst = arith.constant dense<0.000000e+00> : vector<16x32xf32>
    %13 = tpu.matmul %12, %0, %cst {dimension_numbers = #tpu.dot_dimension_numbers<[1], [0], [0], [1], [0, 0, 1, 1], [], []>} : vector<16x32xf32>, vector<32x32xf32>, vector<16x32xf32> -> vector<16x32xf32>
    %14 = vector.broadcast %8 : vector<1x32xf32> to vector<16x32xf32>
    %15 = arith.addf %13, %14 : vector<16x32xf32>
    %cst_10 = arith.constant 0.000000e+00 : f32
    %16 = vector.broadcast %cst_10 : f32 to vector<16x32xf32>
    %17 = arith.maximumf %15, %16 : vector<16x32xf32>
    %cst_11 = arith.constant dense<0.000000e+00> : vector<16x32xf32>
    %18 = tpu.matmul %17, %1, %cst_11 {dimension_numbers = #tpu.dot_dimension_numbers<[1], [0], [0], [1], [0, 0, 1, 1], [], []>} : vector<16x32xf32>, vector<32x32xf32>, vector<16x32xf32> -> vector<16x32xf32>
    %19 = vector.broadcast %9 : vector<1x32xf32> to vector<16x32xf32>
    %20 = arith.addf %18, %19 : vector<16x32xf32>
    %21 = math.tanh %20 : vector<16x32xf32>
    %c0_12 = arith.constant 0 : index
    %c0_13 = arith.constant 0 : index
    %22 = vector.load %arg1[%c0_12, %c0_13] : memref<16x1xi32, #tpu.memory_space<vmem>>, vector<16x1xi32>
    %23 = tpu.iota {dimensions = array<i32: 1>} : vector<16x32xi32>
    %24 = vector.broadcast %22 : vector<16x1xi32> to vector<16x32xi32>
    %25 = arith.cmpi eq, %23, %24 : vector<16x32xi32>
    %26 = arith.extui %25 : vector<16x32xi1> to vector<16x32xi32>
    %27 = arith.sitofp %26 : vector<16x32xi32> to vector<16x32xf32>
    %cst_14 = arith.constant dense<0.000000e+00> : vector<16x32xf32>
    %28 = tpu.matmul %27, %2, %cst_14 {dimension_numbers = #tpu.dot_dimension_numbers<[1], [0], [0], [1], [0, 0, 1, 1], [], []>} : vector<16x32xf32>, vector<32x32xf32>, vector<16x32xf32> -> vector<16x32xf32>
    %29 = vector.broadcast %10 : vector<1x32xf32> to vector<16x32xf32>
    %30 = arith.addf %28, %29 : vector<16x32xf32>
    %c0_i32 = arith.constant 0 : i32
    %31 = vector.broadcast %c0_i32 : i32 to vector<16x1xi32>
    %32 = arith.cmpi ne, %22, %31 : vector<16x1xi32>
    %33 = arith.extui %32 : vector<16x1xi1> to vector<16x1xi32>
    %34 = arith.sitofp %33 : vector<16x1xi32> to vector<16x1xf32>
    %35 = vector.broadcast %34 : vector<16x1xf32> to vector<16x32xf32>
    %36 = arith.mulf %30, %35 : vector<16x32xf32>
    %cst_15 = arith.constant dense<0.000000e+00> : vector<16x32xf32>
    %37 = tpu.matmul %36, %3, %cst_15 {dimension_numbers = #tpu.dot_dimension_numbers<[1], [0], [0], [1], [0, 0, 1, 1], [], []>} : vector<16x32xf32>, vector<32x32xf32>, vector<16x32xf32> -> vector<16x32xf32>
    %cst_16 = arith.constant dense<0.000000e+00> : vector<16x32xf32>
    %38 = tpu.matmul %21, %4, %cst_16 {dimension_numbers = #tpu.dot_dimension_numbers<[1], [0], [0], [1], [0, 0, 1, 1], [], []>} : vector<16x32xf32>, vector<32x32xf32>, vector<16x32xf32> -> vector<16x32xf32>
    %cst_17 = arith.constant dense<0.000000e+00> : vector<16x32xf32>
    %39 = tpu.matmul %21, %5, %cst_17 {dimension_numbers = #tpu.dot_dimension_numbers<[1], [0], [0], [1], [0, 0, 1, 1], [], []>} : vector<16x32xf32>, vector<32x32xf32>, vector<16x32xf32> -> vector<16x32xf32>
    %cst_18 = arith.constant dense<0.000000e+00> : vector<16x16xf32>
    %40 = tpu.matmul %37, %38, %cst_18 {dimension_numbers = #tpu.dot_dimension_numbers<[1], [1], [0], [0], [0, 0, 1, 0], [], []>} : vector<16x32xf32>, vector<16x32xf32>, vector<16x16xf32> -> vector<16x16xf32>
    %cst_19 = arith.constant 0.176776692 : f32
    %41 = vector.broadcast %cst_19 : f32 to vector<16x16xf32>
    %42 = arith.mulf %40, %41 : vector<16x16xf32>
    %43 = tpu.iota {dimensions = array<i32: 0>} : vector<16x16xi32>
    %c3_i32 = arith.constant 3 : i32
    %44 = vector.broadcast %c3_i32 : i32 to vector<16x16xi32>
    %45 = arith.shrsi %43, %44 : vector<16x16xi32>
    %46 = tpu.iota {dimensions = array<i32: 1>} : vector<16x16xi32>
    %c3_i32_20 = arith.constant 3 : i32
    %47 = vector.broadcast %c3_i32_20 : i32 to vector<16x16xi32>
    %48 = arith.shrsi %46, %47 : vector<16x16xi32>
    %49 = arith.cmpi eq, %45, %48 : vector<16x16xi32>
    %cst_21 = arith.constant -1.000000e+30 : f32
    %50 = vector.broadcast %cst_21 : f32 to vector<16x16xf32>
    %51 = arith.select %49, %42, %50 : vector<16x16xi1>, vector<16x16xf32>
    %cst_22 = arith.constant dense<0xFF800000> : vector<16xf32>
    %52 = vector.multi_reduction <maximumf>, %51, %cst_22 [1] : vector<16x16xf32> to vector<16xf32>
    %53 = vector.shape_cast %52 : vector<16xf32> to vector<16x1xf32>
    %54 = vector.broadcast %53 : vector<16x1xf32> to vector<16x16xf32>
    %55 = arith.subf %51, %54 : vector<16x16xf32>
    %56 = math.exp %55 : vector<16x16xf32>
    %cst_23 = arith.constant dense<0.000000e+00> : vector<16xf32>
    %57 = vector.multi_reduction <add>, %56, %cst_23 [1] : vector<16x16xf32> to vector<16xf32>
    %58 = vector.shape_cast %57 : vector<16xf32> to vector<16x1xf32>
    %59 = tpu.reciprocal %58 {approx = true} : vector<16x1xf32> -> vector<16x1xf32>
    %60 = vector.broadcast %59 : vector<16x1xf32> to vector<16x16xf32>
    %61 = arith.mulf %56, %60 : vector<16x16xf32>
    %cst_24 = arith.constant dense<0.000000e+00> : vector<16x32xf32>
    %62 = tpu.matmul %61, %39, %cst_24 {dimension_numbers = #tpu.dot_dimension_numbers<[1], [0], [0], [1], [0, 0, 1, 1], [], []>} : vector<16x16xf32>, vector<16x32xf32>, vector<16x32xf32> -> vector<16x32xf32>
    %cst_25 = arith.constant dense<0.000000e+00> : vector<16x32xf32>
    %63 = tpu.matmul %62, %6, %cst_25 {dimension_numbers = #tpu.dot_dimension_numbers<[1], [0], [0], [1], [0, 0, 1, 1], [], []>} : vector<16x32xf32>, vector<32x32xf32>, vector<16x32xf32> -> vector<16x32xf32>
    %64 = vector.broadcast %11 : vector<1x32xf32> to vector<16x32xf32>
    %65 = arith.addf %63, %64 : vector<16x32xf32>
    %cst_26 = arith.constant dense<0xFF800000> : vector<16xf32>
    %66 = vector.multi_reduction <maximumf>, %65, %cst_26 [1] : vector<16x32xf32> to vector<16xf32>
    %67 = vector.shape_cast %66 : vector<16xf32> to vector<16x1xf32>
    %68 = vector.broadcast %67 : vector<16x1xf32> to vector<16x32xf32>
    %69 = arith.subf %65, %68 : vector<16x32xf32>
    %70 = math.exp %69 : vector<16x32xf32>
    %cst_27 = arith.constant dense<0.000000e+00> : vector<16xf32>
    %71 = vector.multi_reduction <add>, %70, %cst_27 [1] : vector<16x32xf32> to vector<16xf32>
    %72 = vector.shape_cast %71 : vector<16xf32> to vector<16x1xf32>
    %73 = math.log %72 : vector<16x1xf32>
    %74 = vector.broadcast %73 : vector<16x1xf32> to vector<16x32xf32>
    %75 = arith.subf %69, %74 : vector<16x32xf32>
    %c0_28 = arith.constant 0 : index
    %c0_29 = arith.constant 0 : index
    %76 = vector.load %arg3[%c0_28, %c0_29] : memref<16x32xf32, #tpu.memory_space<vmem>>, vector<16x32xf32>
    tpu.vector_store %arg3[%c0_28, %c0_29], %75 {strides = array<i32>} : memref<16x32xf32, #tpu.memory_space<vmem>>, vector<16x32xf32>,
    return
  }
}

</mosaic_0001>

<bundles_post_ra>
// kernel: attention_model_forward.1
= control target key start
LH: loop header
LB: loop body
LE: loop exit
PB: predicated region body
PF: predicated region fallthrough
CT: control target
= control target key end

     0   :  { %v510_v3 = vmov 0   ;;  %s680_s0 = inlined_call_operand.vmem [shape: f32[16,32], index: 0, kind: input, shape index: {}]   ;;  %s681_s1 = inlined_call_operand.vmem [shape: s32[16,1], index: 1, kind: input, shape index: {}]   ;;  %s682_s2 = inlined_call_operand.vmem [shape: f32[232,32], index: 2, kind: input, shape index: {}]   ;;  %s683_s3 = inlined_call_operand.hbm [shape: f32[16,32], index: 3, kind: output, shape index: {}]  }
   0x1   :  { %v18_v0 = vld [vmem:[%s682_s2 + $0x18] sm:$0xff]  ;;  %v17_v1 = vld [vmem:[%s682_s2 + $0x10] sm:$0xff]  ;;  %v16_v2 = vld [vmem:[%s682_s2 + $0x8] sm:$0xff]  ;;  %462 = vset.pattern.permute.xlu0 %v510_v3  ;;  %463 = vset.pattern.permute.xlu1 %v510_v3 }
   0x2   :  { %66 = vmatpush.msra.mxu0 %v18_v0  ;;  %453 = vmatpush.msra.mxu1 %v18_v0  ;;  %v111_v4 = vld [vmem:[%s681_s1] sm:$0xff] }
   0x4   :  { %67 = vmatpush.msra.mxu0 %v17_v1  ;;  %454 = vmatpush.msra.mxu1 %v17_v1 }
   0x5   :  { %8 = vsyncpa [#allocation3], 0  ;;  %v15_v5 = vld [vmem:[%s682_s2] sm:$0xff]  ;;  %116 = vperm.xlu0 %462, %v111_v4   ;;  %vm47_vm0 = vcmask 261120   ;;  %v45_v7 = vld [vmem:[%s680_s0 + $0x8] sm:$0xff]  ;;  %v113_v17 = vlaneseq  ;;  %vm157_vm1 = vcmp.ne.s32.totalorder %v111_v4, 0 }
   0x6   :  { %68 = vmatpush.msra.mxu0 %v16_v2  ;;  %v44_v6 = vld [vmem:[%s680_s0] sm:$0xff]  ;;  %455 = vmatpush.msra.mxu1 %v16_v2  ;;  %v22_v8 = vld [vmem:[%s682_s2 + $0x38] sm:$0xff]  ;;  %v112_v9 = vld [vmem:[%s681_s1 + $0x8] sm:$0xff]  ;;  %v511_v19 = vmov 0.0   ;;  %vm303_vm6 = vcmask 130048   ;;  %s417_s23 = sshll.u32 %s683_s3, 4  ;;  %s418_s23 = int_to_ptr.hbm [resolvable:$true] %s417_s23 }
   0x7   :  { %v26_v10 = vld [vmem:[%s682_s2 + $0x58] sm:$0xff]  ;;  %v21_v11 = vld [vmem:[%s682_s2 + $0x30] sm:$0xff]  ;;  %v20_v13 = vld [vmem:[%s682_s2 + $0x28] sm:$0xff]  ;;  %v586_v18 = vand.u32 127, %v113_v17  ;;  %v437_v20 = vsel %vm157_vm1, 1.0, %v511_v19  ;;  %vm158_vm2 = vcmp.ne.s32.totalorder %v112_v9, 0 }
   0x8   :  { %69 = vmatpush.msra.mxu0 %v15_v5  ;;  %456 = vmatpush.msra.mxu1 %v15_v5  ;;  %v25_v12 = vld [vmem:[%s682_s2 + $0x50] sm:$0xff]  ;;  %v24_v14 = vld [vmem:[%s682_s2 + $0x48] sm:$0xff]  ;;  %v19_v15 = vld [vmem:[%s682_s2 + $0x20] sm:$0xff]  ;;  %v438_v23 = vsel %vm158_vm2, 1.0, %v511_v19  ;;  %v294_v4 = vshrl.u32 %v113_v17, 7  ;;  %s513_s24 = smov 128  }
   0x9   :  { %429 = vmatmul.msk.f32.vlgmr.msra.gmra.mxu0 %vm47_vm0, %v44_v6  ;;  %430 = vmatmul.msk.f32.vlgmr.msra.gmra.mxu1 %vm47_vm0, %v45_v7  ;;  %v23_v16 = vld [vmem:[%s682_s2 + $0x40] sm:$0xff]  ;;  %v34_v34 = vld [vmem:[%s682_s2 + $0x98] sm:$0xff]  ;;  %v33_v36 = vld [vmem:[%s682_s2 + $0x90] sm:$0xff]  ;;  %v298_v6 = vshra.s32 %v586_v18, 3  ;;  %s514_s25 = smov 8  }
   0xa   :  { %98 = vmatpush.msrb.mxu1 %v22_v8  ;;  %146 = vmatpush.msra.mxu2 %v26_v10  ;;  %v593_v25 = vld [vmem:[%s682_s2 + $0xe0] sm:$0xff]  ;;  %v38_v35 = vld [vmem:[%s682_s2 + $0xb8] sm:$0xff]  ;;  %v37_v37 = vld [vmem:[%s682_s2 + $0xb0] sm:$0xff]  ;;  %v296_v5 = vshra.s32 %v294_v4, 3  ;;  %v295_v8 = vadd.s32 8, %v294_v4 }
   0xb   :  { %165 = vperm.xlu1 %463, %v437_v20   ;;  %v46_v27 = vperm.slane %v593_v25, 0  ;;  %222 = vmatpush.msrb.mxu0 %v34_v34  ;;  %v32_v38 = vld [vmem:[%s682_s2 + $0x88] sm:$0xff]  ;;  %v30_v40 = vld [vmem:[%s682_s2 + $0x78] sm:$0xff]  ;;  %v29_v41 = vld [vmem:[%s682_s2 + $0x70] sm:$0xff]  ;;  %v127_v46 = vperm.slane %v593_v25, 2  ;;  %v79_v51 = vperm.slane %v593_v25, 1 }
   0xc   :  { %99 = vmatpush.msrb.mxu1 %v21_v11  ;;  %147 = vmatpush.msra.mxu2 %v25_v12  ;;  %v36_v39 = vld [vmem:[%s682_s2 + $0xa8] sm:$0xff]  ;;  %v31_v43 = vld [vmem:[%s682_s2 + $0x80] sm:$0xff]  ;;  %vm299_vm5 = vcmp.eq.s32.totalorder %v296_v5, %v298_v6  ;;  %v297_v12 = vshra.s32 %v295_v8, 3 }
   0xd   :  { %119 = vperm.xlu0 %462, %v112_v9   ;;  %223 = vmatpush.msrb.mxu0 %v33_v36  ;;  %v28_v42 = vld [vmem:[%s682_s2 + $0x68] sm:$0xff]  ;;  %v35_v44 = vld [vmem:[%s682_s2 + $0xa0] sm:$0xff] }
   0xe   :  { %100 = vmatpush.msrb.mxu1 %v20_v13  ;;  %148 = vmatpush.msra.mxu2 %v24_v14  ;;  %v27_v45 = vld [vmem:[%s682_s2 + $0x60] sm:$0xff]  ;;  %vm300_vm7 = vcmp.eq.s32.totalorder %v297_v12, %v298_v6 }
   0xf   :  { %193 = vmatpush.msra.mxu3 %v30_v40  ;;  %224 = vmatpush.msrb.mxu0 %v32_v38  ;;  %v355_v40 = vperm.slane %v593_v25, 3 }
  0x10   :  { %101 = vmatpush.msrb.mxu1 %v19_v15  ;;  %149 = vmatpush.msra.mxu2 %v23_v16 }
  0x11   :  { %194 = vmatpush.msra.mxu3 %v29_v41  ;;  %225 = vmatpush.msrb.mxu0 %v31_v43 }
  0x12   :  { %245 = vmatpush.msra.mxu1 %v38_v35 }
  0x13   :  { %170 = vperm.xlu1 %463, %v438_v23   ;;  %195 = vmatpush.msra.mxu3 %v28_v42 }
  0x14   :  { %246 = vmatpush.msra.mxu1 %v37_v37  ;;  %v39_v37 = vld [vmem:[%s682_s2 + $0xc0] sm:$0xff] }
  0x15   :  { %196 = vmatpush.msra.mxu3 %v27_v45 }
  0x16   :  { %247 = vmatpush.msra.mxu1 %v36_v39 }
  0x18   :  { %248 = vmatpush.msra.mxu1 %v35_v44 }
  0x77   :  { %v117_v21 = vpop.permute.xlu0 %116 }
  0x78   :  { %vm121_vm3 = vcmp.eq.s32.totalorder %v586_v18, %v117_v21 }
  0x79   :  { %v433_v22 = vsel %vm121_vm3, 1.0, %v511_v19 }
  0x7a   :  { %435 = vmatmul.msk.f32.vlgmr.msra.gmra.mxu2 %vm47_vm0, %v433_v22 }
  0x7d   :  { %v166_v47 = vpop.permute.xlu1 %165 }
  0x7f   :  { %v120_v24 = vpop.permute.xlu0 %119 }
  0x80   :  { %vm122_vm4 = vcmp.eq.s32.totalorder %v586_v18, %v120_v24 }
  0x81   :  { %v434_v26 = vsel %vm122_vm4, 1.0, %v511_v19 }
  0x82   :  { %436 = vmatmul.msk.f32.gmra.mxu2 %vm47_vm0, %v434_v26 }
  0x85   :  { %v171_v53 = vpop.permute.xlu1 %170 }
  0x86   :  { %v71_v28 = vpop.f32.mrf.mxu0  ;;  %v74_v30 = vpop.f32.mrf.mxu1 }
  0x87   :  { %v72_v29 = vadd.f32 %v71_v28, %v46_v27  ;;  %v75_v32 = vadd.f32 %v74_v30, %v46_v27  ;;  %v42_v28 = vld [vmem:[%s682_s2 + $0xd8] sm:$0xff]  ;;  %v40_v30 = vld [vmem:[%s682_s2 + $0xc8] sm:$0xff] }
  0x88   :  { %374 = vmatpush.msra.mxu0 %v42_v28 }
  0x89   :  { %v77_v31 = vmax.f32 %v72_v29, 0.0  ;;  %v78_v33 = vmax.f32 %v75_v32, 0.0  ;;  %v41_v29 = vld [vmem:[%s682_s2 + $0xd0] sm:$0xff]  ;;  %s512_s2 = smov [#allocation2]  }
  0x8a   :  { %375 = vmatpush.msra.mxu0 %v41_v29  ;;  %s415_s20 = sshll.u32 %s512_s2, 4  ;;  %s416_s20 = int_to_ptr.vmem [resolvable:$true] %s415_s20 }
  0x8b   :  { %431 = vmatmul.msk.f32.vlgmr.msrb.gmra.mxu1 %vm47_vm0, %v77_v31 }
  0x8c   :  { %376 = vmatpush.msra.mxu0 %v40_v30 }
  0x8e   :  { %377 = vmatpush.msra.mxu0 %v39_v37 }
  0x93   :  { %432 = vmatmul.msk.f32.gmra.mxu1 %vm47_vm0, %v78_v33 }
  0xfd   :  { %v151_v48 = vpop.f32.mrf.mxu2 }
  0xfe   :  { %v152_v49 = vadd.f32 %v151_v48, %v127_v46 }
 0x100   :  { %v173_v50 = vmul.f32 %v166_v47, %v152_v49 }
 0x102   :  { %439 = vmatmul.msk.f32.vlgmr.msra.gmra.mxu3 %vm47_vm0, %v173_v50 }
 0x105   :  { %v154_v52 = vpop.f32.mrf.mxu2 }
 0x106   :  { %v155_v54 = vadd.f32 %v154_v52, %v127_v46 }
 0x108   :  { %v103_v55 = vpop.f32.mrf.mxu1  ;;  %v174_v56 = vmul.f32 %v171_v53, %v155_v54 }
 0x109   :  { %v104_v57 = vadd.f32 %v103_v55, %v79_v51 }
 0x10a   :  { %440 = vmatmul.msk.f32.gmra.mxu3 %vm47_vm0, %v174_v56 }
 0x10b   :  { %464 = vtanh.f32 %v104_v57 }
 0x110   :  { %v106_v58 = vpop.f32.mrf.mxu1 }
 0x111   :  { %v465_v59 = vpop.eup %464  ;;  %v107_v60 = vadd.f32 %v106_v58, %v79_v51 }
 0x112   :  { %441 = vmatmul.msk.f32.vlgmr.msrb.gmra.mxu0 %vm47_vm0, %v465_v59  ;;  %443 = vmatmul.msk.f32.vlgmr.msra.gmra.mxu1 %vm47_vm0, %v465_v59 }
 0x113   :  { %466 = vtanh.f32 %v107_v60 }
 0x119   :  { %v467_v61 = vpop.eup %466 }
 0x11a   :  { %442 = vmatmul.msk.f32.gmra.mxu0 %vm47_vm0, %v467_v61  ;;  %444 = vmatmul.msk.f32.gmra.mxu1 %vm47_vm0, %v467_v61 }
 0x185   :  { %v198_v2 = vpop.f32.mrf.mxu3 }
 0x18d   :  { %v201_v3 = vpop.f32.mrf.mxu3 }
 0x18f   :  { %v227_v62 = vpop.f32.mrf.mxu0  ;;  %v250_v63 = vpop.f32.mrf.mxu1 }
 0x197   :  { %v230_v0 = vpop.f32.mrf.mxu0  ;;  %v253_v1 = vpop.f32.mrf.mxu1 }
 0x198   :  { %445 = vmatpush.xpose.msk.msrb.mxu2 %vm47_vm0, %v230_v0  ;;  %346 = vmatpush.msrb.mxu3 %v253_v1 }
 0x19a   :  { %347 = vmatpush.msrb.mxu3 %v250_v63 }
 0x19c   :  { %446 = vmatpush.xpose.msk.msrb.mxu2 %vm47_vm0, %v227_v62 }
 0x19f   :  { %447 = vmatmul.msk.f32.vlgmr.msrb.gmra.mxu2 %vm47_vm0, %v198_v2 }
 0x1a7   :  { %448 = vmatmul.msk.f32.gmra.mxu2 %vm47_vm0, %v201_v3 }
 0x222   :  { %v285_v7 = vpop.f32.mrf.mxu2 }
 0x223   :  { %v291_v9 = vmul.f32 0.17677669, %v285_v7 }
 0x225   :  { %v301_v10 = vsel %vm299_vm5, %v291_v9, -1e+30 }
 0x226   :  { %v304_v11 = vsel %vm303_vm6, %v301_v10, -inf }
 0x227   :  { %305 = vmax.xlane.f32.xlu2 %v304_v11 }
 0x22a   :  { %v288_v13 = vpop.f32.mrf.mxu2 }
 0x22b   :  { %v292_v14 = vmul.f32 0.17677669, %v288_v13 }
 0x22d   :  { %v302_v15 = vsel %vm300_vm7, %v292_v14, -1e+30 }
 0x22e   :  { %v307_v16 = vsel %vm303_vm6, %v302_v15, -inf }
 0x22f   :  { %308 = vmax.xlane.f32.xlu2 %v307_v16 }
 0x29a   :  { %v306_v17 = vpop.xlane.xlu2 %305 }
 0x29b   :  { %v310_v19 = vsub.f32 %v301_v10, %v306_v17 }
 0x29d   :  { %v312_v18 = vmul.f32 1.442695, %v310_v19 }
 0x29f   :  { %468 = vpow2.f32 %v312_v18 }
 0x2a2   :  { %v309_v20 = vpop.xlane.xlu2 %308 }
 0x2a3   :  { %v311_v21 = vsub.f32 %v302_v15, %v309_v20 }
 0x2a5   :  { %v469_v22 = vpop.eup %468  ;;  %v314_v23 = vmul.f32 1.442695, %v311_v21 }
 0x2a6   :  { %v316_v24 = vsel %vm303_vm6, %v469_v22, 0.0 }
 0x2a7   :  { %470 = vpow2.f32 %v314_v23  ;;  %317 = vadd.xlane.f32.xlu0 %v316_v24 }
 0x2ad   :  { %v471_v26 = vpop.eup %470 }
 0x2ae   :  { %v319_v27 = vsel %vm303_vm6, %v471_v26, 0.0 }
 0x2af   :  { %320 = vadd.xlane.f32.xlu1 %v319_v27 }
 0x31a   :  { %v318_v31 = vpop.xlane.xlu0 %317 }
 0x31b   :  { %472 = vrcp.f32 %v318_v31 }
 0x321   :  { %v473_v32 = vpop.eup %472 }
 0x322   :  { %v324_v33 = vmul.f32 %v473_v32, %v469_v22  ;;  %v321_v34 = vpop.xlane.xlu1 %320 }
 0x323   :  { %474 = vrcp.f32 %v321_v34 }
 0x324   :  { %449 = vmatmul.msk.f32.vlgmr.msrb.gmra.mxu3 %vm303_vm6, %v324_v33 }
 0x329   :  { %v475_v35 = vpop.eup %474 }
 0x32a   :  { %v325_v36 = vmul.f32 %v475_v35, %v471_v26 }
 0x32c   :  { %450 = vmatmul.msk.f32.gmra.mxu3 %vm303_vm6, %v325_v36 }
 0x3a7   :  { %v349_v38 = vpop.f32.mrf.mxu3 }
 0x3a8   :  { %451 = vmatmul.msk.f32.vlgmr.msra.gmra.mxu0 %vm47_vm0, %v349_v38 }
 0x3af   :  { %v352_v39 = vpop.f32.mrf.mxu3 }
 0x3b0   :  { %452 = vmatmul.msk.f32.gmra.mxu0 %vm47_vm0, %v352_v39 }
 0x425   :  { %v379_v41 = vpop.f32.mrf.mxu0 }
 0x426   :  { %v380_v42 = vadd.f32 %v379_v41, %v355_v40 }
 0x428   :  { %v385_v43 = vsel %vm47_vm0, %v380_v42, -inf }
 0x429   :  { %386 = vmax.xlane.f32.xlu2 %v385_v43 }
 0x42d   :  { %v382_v44 = vpop.f32.mrf.mxu0 }
 0x42e   :  { %v383_v45 = vadd.f32 %v382_v44, %v355_v40 }
 0x430   :  { %v388_v46 = vsel %vm47_vm0, %v383_v45, -inf }
 0x431   :  { %389 = vmax.xlane.f32.xlu2 %v388_v46 }
 0x49c   :  { %v387_v47 = vpop.xlane.xlu2 %386 }
 0x49d   :  { %v391_v48 = vsub.f32 %v380_v42, %v387_v47 }
 0x49f   :  { %v393_v49 = vmul.f32 1.442695, %v391_v48 }
 0x4a1   :  { %476 = vpow2.f32 %v393_v49 }
 0x4a4   :  { %v390_v50 = vpop.xlane.xlu2 %389 }
 0x4a5   :  { %v392_v51 = vsub.f32 %v383_v45, %v390_v50 }
 0x4a7   :  { %v477_v52 = vpop.eup %476  ;;  %v395_v53 = vmul.f32 1.442695, %v392_v51 }
 0x4a8   :  { %v397_v25 = vsel %vm47_vm0, %v477_v52, 0.0 }
 0x4a9   :  { %478 = vpow2.f32 %v395_v53  ;;  %398 = vadd.xlane.f32.xlu2 %v397_v25 }
 0x4af   :  { %v479_v54 = vpop.eup %478 }
 0x4b0   :  { %v400_v55 = vsel %vm47_vm0, %v479_v54, 0.0 }
 0x4b1   :  { %401 = vadd.xlane.f32.xlu2 %v400_v55 }
 0x51c   :  { %v399_v56 = vpop.xlane.xlu2 %398 }
 0x51d   :  { %480 = vlog2.f32 %v399_v56 }
 0x523   :  { %v481_v57 = vpop.eup %480 }
 0x524   :  { %v404_v58 = vmul.f32 0.6931472, %v481_v57  ;;  %v402_v59 = vpop.xlane.xlu2 %401 }
 0x525   :  { %482 = vlog2.f32 %v402_v59 }
 0x526   :  { %v407_v60 = vsub.f32 %v391_v48, %v404_v58 }
 0x528   :  { %409 = vst.msk [vmem:[#allocation2] sm:$0xff] %vm47_vm0, %v407_v60 }
 0x52b   :  { %v483_v61 = vpop.eup %482 }
 0x52c   :  { %v406_v62 = vmul.f32 0.6931472, %v483_v61 }
 0x52e   :  { %v408_v63 = vsub.f32 %v392_v51, %v406_v62 }
 0x530   :  { %410 = vst.msk [vmem:[#allocation2 + $0x8] sm:$0xff] %vm47_vm0, %v408_v63 }
 0x531   :  { %423 = dma.vmem_to_hbm [thread:$0]  %s416_s20, 256, %s418_s23, [#allocation3], %s513_s24, %s513_s24, %s514_s25  }
 0x532   :  { %508 = dma.done.wait [#allocation3], 256  }
 0x533   :  { %509 = vsyncadd [#allocation3], 4294967040 }
 0x534   :  { %428 = vsyncpa [#allocation3], 1 }

</bundles_post_ra>
